<compile_context>
chip_gen: v6e
topology: v6e:2x2x1
jax: 0.10.0
libtpu: 0.0.40
codegen_flags: <defaults>
</compile_context>

<pallas_src>
import functools

import numpy as np

import jax
import jax.numpy as jnp
from jax.experimental import pallas as pl
from jax.experimental.pallas import tpu as pltpu


# --------------------------- loss type constants ----------------------------

_LOSS_FOCAL = 0
_LOSS_BCE = 1
_LOSS_SMOOTH_L1 = 2

# loss name -> (pred key, target key, loss type, output name)
_LOSS_TABLE = {
    "phase":     ("pred_phase",     "labels_phase",     _LOSS_FOCAL,     "loss_phase"),
    "phase_ant": ("pred_phase_ant", "labels_phase_ant", _LOSS_SMOOTH_L1, "loss_phase_ant"),
    "tool":      ("pred_tool",      "labels_tool",      _LOSS_BCE,       "loss_tool"),
    "tool_ant":  ("pred_tool_ant",  "labels_tool_ant",  _LOSS_SMOOTH_L1, "loss_tool_ant"),
}

# Compile-time group ordering and per-group pred padding value.  Padding is
# chosen so padded elements contribute *exactly* zero loss (invariant: if this
# ever changes, an explicit iota mask must be reintroduced):
#   focal/BCE : pred = -1e4, tgt = 0 -> bce = 0 + 0 + log1p(exp(-1e4)) == 0 (f32)
#   SmoothL1  : pred = 0,    tgt = 0 -> |d| = 0 -> loss == 0
_GROUP_ORDER = (_LOSS_FOCAL, _LOSS_BCE, _LOSS_SMOOTH_L1)
_PRED_PAD = {_LOSS_FOCAL: -1.0e4, _LOSS_BCE: -1.0e4, _LOSS_SMOOTH_L1: 0.0}

# Lane tile for the reduction grid axis.  (g_pad, _LANE_TILE) f32 x 2 slabs x 2
# pipeline buffers stays far below v7x's 32 MiB scoped VMEM; grow on v5e/v6e if
# B*C reaches the multi-MB range (bigger tiles amortize the ~0.35us/step cost).
_LANE_TILE = 4096


# ------------------------------ Pallas kernel -------------------------------


def _criterion_kernel(pred_ref, tgt_ref, o_ref, *, alpha, group_types):
    """One grid point = (loss-type group g, lane tile k).

    pred_ref/tgt_ref : (g_pad, TW)  f32 -- lane tile of the packed slab.
    o_ref            : (g_pad, 128) f32 -- per-row loss sums broadcast over
                       lanes; resident accumulator across the k (lane) axis.
    """
    g = pl.program_id(0)

    @pl.when(pl.program_id(1) == 0)
    def _init():
        o_ref[...] = jnp.zeros_like(o_ref)

    x = pred_ref[...]
    t = tgt_ref[...]

    for gi, ltype in enumerate(group_types):

        @pl.when(g == gi)
        def _compute(ltype=ltype):
            if ltype == _LOSS_SMOOTH_L1:
                # SmoothL1 (Huber, beta = 1.0).
                d = jnp.abs(x - t)
                loss = jnp.where(d < 1.0, 0.5 * d * d, d - 0.5)
            else:
                # Numerically stable BCE-with-logits; e = exp(-|x|) is shared
                # with the sigmoid below (one EUP exp instead of two).
                e = jnp.exp(-jnp.abs(x))
                bce = jnp.maximum(x, 0.0) - x * t + jnp.log1p(e)
                if ltype == _LOSS_BCE:
                    loss = bce
                else:
                    # Sigmoid focal loss, gamma == 2 -> explicit square.
                    # Full-precision reciprocal keeps the 1e-4 check; switch to
                    # pl.reciprocal(1+e, approx=True) if ~0.1% error is OK.
                    inv = 1.0 / (1.0 + e)
                    p = jnp.where(x >= 0.0, inv, e * inv)   # == sigmoid(x)
                    p_t = p * t + (1.0 - p) * (1.0 - t)
                    om = 1.0 - p_t
                    loss = bce * om * om
                    if alpha >= 0:
                        loss = (alpha * t + (1.0 - alpha) * (1.0 - t)) * loss
            # Per-row partial sum; (g_pad, 1) broadcasts across the 128 lanes
            # so the store stays lane-dense / unmasked.
            o_ref[...] += jnp.sum(loss, axis=1, keepdims=True)


# ---------------------------- host-side packing ------------------------------


def _pack_group(arrs, w_pad, g_pad, pad_val):
    """Stack a group of (B, C) arrays into a (g_pad, w_pad) f32 slab."""
    shapes = set(tuple(a.shape) for a in arrs)
    if len(shapes) == 1:
        mat = jnp.stack(arrs).astype(jnp.float32).reshape(len(arrs), -1)
    else:
        # Mixed shapes inside a group: fall back to per-row flatten + pad.
        w_loc = max(int(np.prod(a.shape)) for a in arrs)
        mat = jnp.stack([
            jnp.pad(jnp.reshape(a, (-1,)).astype(jnp.float32),
                    (0, w_loc - int(np.prod(a.shape))), constant_values=pad_val)
            for a in arrs
        ])
    n, w = mat.shape
    return jnp.pad(mat, ((0, g_pad - n), (0, w_pad - w)), constant_values=pad_val)


def _fused_criterion(names, preds, tgts, types, alpha):
    """Compute every requested loss scalar with ONE pallas_call.

    Rows are grouped by loss type (compile-time order focal | BCE | SmoothL1);
    the kernel computes each loss only on its own group block.  Returns
    {name: scalar jnp array}.
    """
    n = len(preds)
    batch = int(preds[0].shape[0])
    sizes = [int(np.prod(p.shape)) for p in preds]
    w_real = max(sizes)

    # Lane tiling: single tile when everything fits, else a _LANE_TILE-wide
    # reduction grid accumulated into the resident output block.
    if w_real <= _LANE_TILE:
        tw = max(128, ((w_real + 127) // 128) * 128)
    else:
        tw = _LANE_TILE
    w_pad = ((w_real + tw - 1) // tw) * tw
    n_lane_tiles = w_pad // tw

    # Group instances by loss type (compile-time ordering).
    groups = []
    for lt in _GROUP_ORDER:
        idxs = [i for i, t in enumerate(types) if t == lt]
        if idxs:
            groups.append((lt, idxs))
    n_groups = len(groups)
    g_pad = max(8, ((max(len(ix) for _, ix in groups) + 7) // 8) * 8)

    pred_blocks, tgt_blocks, row_of = [], [], {}
    for gi, (lt, idxs) in enumerate(groups):
        for j, i in enumerate(idxs):
            row_of[i] = gi * g_pad + j
        pred_blocks.append(
            _pack_group([preds[i] for i in idxs], w_pad, g_pad, _PRED_PAD[lt]))
        # TODO(synk): targets could be packed as bf16 on v6e/v7x to halve their
        # HBM bytes; kept f32 so the same code is optimal on v5e too.
        tgt_blocks.append(
            _pack_group([tgts[i] for i in idxs], w_pad, g_pad, 0.0))
    pred_mat = pred_blocks[0] if n_groups == 1 else jnp.concatenate(pred_blocks, axis=0)
    tgt_mat = tgt_blocks[0] if n_groups == 1 else jnp.concatenate(tgt_blocks, axis=0)

    kernel = functools.partial(
        _criterion_kernel,
        alpha=float(alpha),
        group_types=tuple(lt for lt, _ in groups),
    )

    out = pl.pallas_call(
        kernel,
        out_shape=jax.ShapeDtypeStruct((n_groups * g_pad, 128), jnp.float32),
        grid=(n_groups, n_lane_tiles),
        in_specs=[
            pl.BlockSpec((g_pad, tw), lambda g, k: (g, k)),
            pl.BlockSpec((g_pad, tw), lambda g, k: (g, k)),
        ],
        out_specs=pl.BlockSpec((g_pad, 128), lambda g, k: (g, 0)),
        compiler_params=pltpu.CompilerParams(
            # group axis shards across TensorCores (v7x); lane axis is the
            # accumulated reduction into the resident output block.
            dimension_semantics=("parallel", "arbitrary")),
    )(pred_mat, tgt_mat)

    # mean over B*C then *C  ==  sum / B : one scale + one gather on the host,
    # then cheap per-name slices of the tiny (n,) vector.
    flat = out[:, 0] * (1.0 / float(batch))
    rows = jnp.asarray(np.array([row_of[i] for i in range(n)], dtype=np.int32))
    vals = flat[rows]
    return {name: vals[i] for i, name in enumerate(names)}


# --------------------------- SetCriterion (JAX) -----------------------------


class SetCriterion:
    def __init__(self, weight_dict, losses, focal_alpha=0.25):
        self.weight_dict = weight_dict
        self.losses = losses
        self.focal_alpha = focal_alpha

    # Kept for API compatibility with the reference module (single-loss path).
    def get_loss(self, loss, outputs, targets):
        assert loss in _LOSS_TABLE, f"do you really want to compute {loss} loss?"
        pkey, tkey, ltype, lname = _LOSS_TABLE[loss]
        assert pkey in outputs
        tgt = jnp.stack([t[tkey] for t in targets])
        return _fused_criterion([lname], [outputs[pkey]], [tgt], [ltype],
                                self.focal_alpha)

    def forward(self, outputs, targets):
        # Hoist target stacking: once per label type, shared by main + aux sets.
        stacked_tgt = {}
        for loss in self.losses:
            assert loss in _LOSS_TABLE, f"do you really want to compute {loss} loss?"
            _, tkey, _, _ = _LOSS_TABLE[loss]
            stacked_tgt[loss] = jnp.stack([t[tkey] for t in targets])

        # Collect every loss instance (main head + each aux decoder layer).
        sets = [("", outputs)]
        if "aux_outputs" in outputs:
            sets += [(f"_{i}", aux) for i, aux in enumerate(outputs["aux_outputs"])]

        names, preds, tgts, types = [], [], [], []
        for suffix, out_d in sets:
            for loss in self.losses:
                pkey, _, ltype, lname = _LOSS_TABLE[loss]
                assert pkey in out_d
                names.append(lname + suffix)
                preds.append(out_d[pkey])
                tgts.append(stacked_tgt[loss])
                types.append(ltype)

        # One fused kernel launch for all losses of all heads.
        return _fused_criterion(names, preds, tgts, types, self.focal_alpha)

    __call__ = forward


# ------------------------- pure-JAX reference check -------------------------


def _reference_losses(outputs, targets, losses, alpha):
    def _bce(x, t):
        return jnp.maximum(x, 0.0) - x * t + jnp.log1p(jnp.exp(-jnp.abs(x)))

    def _focal_mean(x, t):
        p = jax.nn.sigmoid(x)
        ce = _bce(x, t)
        p_t = p * t + (1.0 - p) * (1.0 - t)
        l = ce * (1.0 - p_t) ** 2
        if alpha >= 0:
            l = (alpha * t + (1.0 - alpha) * (1.0 - t)) * l
        return jnp.mean(l)

    def _sl1_mean(x, t):
        d = jnp.abs(x - t)
        return jnp.mean(jnp.where(d < 1.0, 0.5 * d * d, d - 0.5))

    def _bce_mean(x, t):
        return jnp.mean(_bce(x, t))

    fns = {_LOSS_FOCAL: _focal_mean, _LOSS_SMOOTH_L1: _sl1_mean, _LOSS_BCE: _bce_mean}
    res = {}
    sets = [("", outputs)]
    if "aux_outputs" in outputs:
        sets += [(f"_{i}", a) for i, a in enumerate(outputs["aux_outputs"])]
    for suf, od in sets:
        for loss in losses:
            pkey, tkey, ltype, lname = _LOSS_TABLE[loss]
            x = od[pkey].astype(jnp.float32)
            t = jnp.stack([tt[tkey] for tt in targets]).astype(jnp.float32)
            res[lname + suf] = fns[ltype](x, t) * x.shape[1]
    return res


# ----------------------------------- main ------------------------------------


if __name__ == "__main__":
    key = jax.random.PRNGKey(0)
    B = 2            # batch size
    NUM_PHASE = 7    # phase classes
    NUM_TOOL = 7     # tool classes

    keys = jax.random.split(key, 12)

    def preds(k0, k1, k2, k3):
        return {
            "pred_phase": jax.random.normal(k0, (B, NUM_PHASE), jnp.float32),
            "pred_phase_ant": jax.random.normal(k1, (B, NUM_PHASE), jnp.float32),
            "pred_tool": jax.random.normal(k2, (B, NUM_TOOL), jnp.float32),
            "pred_tool_ant": jax.random.normal(k3, (B, NUM_TOOL), jnp.float32),
        }

    outputs = preds(*keys[0:4])
    outputs["aux_outputs"] = [preds(*keys[4:8])]  # one auxiliary decoder layer

    # Per-sample target dicts (list of dicts), mirroring the PyTorch interface.
    phase_ids = jax.random.randint(keys[8], (B,), 0, NUM_PHASE)
    phase_onehot = jax.nn.one_hot(phase_ids, NUM_PHASE, dtype=jnp.float32)
    tool_multi = (jax.random.uniform(keys[9], (B, NUM_TOOL)) > 0.5).astype(jnp.float32)
    phase_ant = jax.random.uniform(keys[10], (B, NUM_PHASE), dtype=jnp.float32)
    tool_ant = jax.random.uniform(keys[11], (B, NUM_TOOL), dtype=jnp.float32)

    targets = [
        {
            "labels_phase": phase_onehot[b],
            "labels_phase_ant": phase_ant[b],
            "labels_tool": tool_multi[b],
            "labels_tool_ant": tool_ant[b],
        }
        for b in range(B)
    ]

    weight_dict = {
        "loss_phase": 1.0,
        "loss_phase_ant": 1.0,
        "loss_tool": 1.0,
        "loss_tool_ant": 1.0,
    }
    losses = ["phase", "phase_ant", "tool", "tool_ant"]
    criterion = SetCriterion(weight_dict, losses=losses, focal_alpha=0.25)

    loss_dict = criterion(outputs, targets)
    loss_dict = jax.tree_util.tree_map(jax.block_until_ready, loss_dict)

    # Correctness: compare against a pure-JAX reference implementation.
    ref = _reference_losses(outputs, targets, losses, 0.25)
    assert set(loss_dict.keys()) == set(ref.keys())
    for k, v in loss_dict.items():
        assert jnp.isfinite(v), f"non-finite loss {k}"
        np.testing.assert_allclose(
            np.asarray(v, dtype=np.float32),
            np.asarray(ref[k], dtype=np.float32),
            rtol=1e-4, atol=1e-5,
            err_msg=f"mismatch for {k}",
        )

    print("KERNEL_OK")
</pallas_src>

<mosaic_0001>
module attributes {stable_mosaic.version = 11 : i64} {
  func.func @_criterion_kernel(%arg0: i32, %arg1: i32, %arg2: memref<8x128xf32, #tpu.memory_space<vmem>>, %arg3: memref<8x128xf32, #tpu.memory_space<vmem>>, %arg4: memref<8x128xf32, #tpu.memory_space<vmem>>) attributes {dimension_semantics = [#tpu.dimension_semantics<parallel>, #tpu.dimension_semantics<arbitrary>], iteration_bounds = array<i64: 3, 1>, scalar_prefetch = 0 : i64, scratch_operands = 0 : i64, tpu.core_type = #tpu.core_type<tc>, window_params = [{transform_indices = @transform_0, window_bounds = array<i64: 8, 128>}, {transform_indices = @transform_1, window_bounds = array<i64: 8, 128>}, {transform_indices = @transform_2, window_bounds = array<i64: 8, 128>}]} {
    %c0_i32 = arith.constant 0 : i32
    %0 = arith.cmpi eq, %arg1, %c0_i32 : i32
    %1 = arith.extui %0 : i1 to i32
    %c0_i32_0 = arith.constant 0 : i32
    %2 = arith.cmpi ne, %1, %c0_i32_0 : i32
    scf.if %2 {
      %cst = arith.constant 0.000000e+00 : f32
      %14 = vector.broadcast %cst : f32 to vector<8x128xf32>
      %c0_8 = arith.constant 0 : index
      %c0_9 = arith.constant 0 : index
      %15 = vector.load %arg4[%c0_8, %c0_9] : memref<8x128xf32, #tpu.memory_space<vmem>>, vector<8x128xf32>
      tpu.vector_store %arg4[%c0_8, %c0_9], %14 {strides = array<i32>} : memref<8x128xf32, #tpu.memory_space<vmem>>, vector<8x128xf32>,
    } else {
    }
    %c0 = arith.constant 0 : index
    %c0_1 = arith.constant 0 : index
    %3 = vector.load %arg2[%c0, %c0_1] : memref<8x128xf32, #tpu.memory_space<vmem>>, vector<8x128xf32>
    %c0_2 = arith.constant 0 : index
    %c0_3 = arith.constant 0 : index
    %4 = vector.load %arg3[%c0_2, %c0_3] : memref<8x128xf32, #tpu.memory_space<vmem>>, vector<8x128xf32>
    %c0_i32_4 = arith.constant 0 : i32
    %5 = arith.cmpi eq, %arg0, %c0_i32_4 : i32
    %6 = arith.extui %5 : i1 to i32
    %c0_i32_5 = arith.constant 0 : i32
    %7 = arith.cmpi ne, %6, %c0_i32_5 : i32
    scf.if %7 {
      %14 = math.absf %3 : vector<8x128xf32>
      %cst = arith.constant 0.000000e+00 : f32
      %15 = vector.broadcast %cst : f32 to vector<8x128xf32>
      %16 = arith.subf %15, %14 : vector<8x128xf32>
      %17 = math.exp %16 : vector<8x128xf32>
      %cst_8 = arith.constant 0.000000e+00 : f32
      %18 = vector.broadcast %cst_8 : f32 to vector<8x128xf32>
      %19 = arith.maximumf %3, %18 : vector<8x128xf32>
      %20 = arith.mulf %3, %4 : vector<8x128xf32>
      %21 = arith.subf %19, %20 : vector<8x128xf32>
      %22 = math.log1p %17 : vector<8x128xf32>
      %23 = arith.addf %21, %22 : vector<8x128xf32>
      %cst_9 = arith.constant 1.000000e+00 : f32
      %24 = vector.broadcast %cst_9 : f32 to vector<8x128xf32>
      %25 = arith.addf %24, %17 : vector<8x128xf32>
      %cst_10 = arith.constant 1.000000e+00 : f32
      %26 = vector.broadcast %cst_10 : f32 to vector<8x128xf32>
      %27 = arith.divf %26, %25 : vector<8x128xf32>
      %cst_11 = arith.constant 0.000000e+00 : f32
      %28 = vector.broadcast %cst_11 : f32 to vector<8x128xf32>
      %29 = arith.cmpf oge, %3, %28 : vector<8x128xf32>
      %30 = arith.mulf %17, %27 : vector<8x128xf32>
      %31 = arith.select %29, %27, %30 : vector<8x128xi1>, vector<8x128xf32>
      %32 = arith.mulf %31, %4 : vector<8x128xf32>
      %cst_12 = arith.constant 1.000000e+00 : f32
      %33 = vector.broadcast %cst_12 : f32 to vector<8x128xf32>
      %34 = arith.subf %33, %31 : vector<8x128xf32>
      %cst_13 = arith.constant 1.000000e+00 : f32
      %35 = vector.broadcast %cst_13 : f32 to vector<8x128xf32>
      %36 = arith.subf %35, %4 : vector<8x128xf32>
      %37 = arith.mulf %34, %36 : vector<8x128xf32>
      %38 = arith.addf %32, %37 : vector<8x128xf32>
      %cst_14 = arith.constant 1.000000e+00 : f32
      %39 = vector.broadcast %cst_14 : f32 to vector<8x128xf32>
      %40 = arith.subf %39, %38 : vector<8x128xf32>
      %41 = arith.mulf %23, %40 : vector<8x128xf32>
      %42 = arith.mulf %41, %40 : vector<8x128xf32>
      %cst_15 = arith.constant 2.500000e-01 : f32
      %43 = vector.broadcast %cst_15 : f32 to vector<8x128xf32>
      %44 = arith.mulf %43, %4 : vector<8x128xf32>
      %cst_16 = arith.constant 1.000000e+00 : f32
      %45 = vector.broadcast %cst_16 : f32 to vector<8x128xf32>
      %46 = arith.subf %45, %4 : vector<8x128xf32>
      %cst_17 = arith.constant 7.500000e-01 : f32
      %47 = vector.broadcast %cst_17 : f32 to vector<8x128xf32>
      %48 = arith.mulf %47, %46 : vector<8x128xf32>
      %49 = arith.addf %44, %48 : vector<8x128xf32>
      %50 = arith.mulf %49, %42 : vector<8x128xf32>
      %c0_18 = arith.constant 0 : index
      %c0_19 = arith.constant 0 : index
      %51 = vector.load %arg4[%c0_18, %c0_19] : memref<8x128xf32, #tpu.memory_space<vmem>>, vector<8x128xf32>
      %cst_20 = arith.constant dense<0.000000e+00> : vector<8xf32>
      %52 = vector.multi_reduction <add>, %50, %cst_20 [1] : vector<8x128xf32> to vector<8xf32>
      %53 = vector.shape_cast %52 : vector<8xf32> to vector<8x1xf32>
      %54 = vector.broadcast %53 : vector<8x1xf32> to vector<8x128xf32>
      %55 = arith.addf %51, %54 : vector<8x128xf32>
      %c0_21 = arith.constant 0 : index
      %c0_22 = arith.constant 0 : index
      %56 = vector.load %arg4[%c0_21, %c0_22] : memref<8x128xf32, #tpu.memory_space<vmem>>, vector<8x128xf32>
      tpu.vector_store %arg4[%c0_21, %c0_22], %55 {strides = array<i32>} : memref<8x128xf32, #tpu.memory_space<vmem>>, vector<8x128xf32>,
    } else {
    }
    %c1_i32 = arith.constant 1 : i32
    %8 = arith.cmpi eq, %arg0, %c1_i32 : i32
    %9 = arith.extui %8 : i1 to i32
    %c0_i32_6 = arith.constant 0 : i32
    %10 = arith.cmpi ne, %9, %c0_i32_6 : i32
    scf.if %10 {
      %14 = math.absf %3 : vector<8x128xf32>
      %cst = arith.constant 0.000000e+00 : f32
      %15 = vector.broadcast %cst : f32 to vector<8x128xf32>
      %16 = arith.subf %15, %14 : vector<8x128xf32>
      %17 = math.exp %16 : vector<8x128xf32>
      %cst_8 = arith.constant 0.000000e+00 : f32
      %18 = vector.broadcast %cst_8 : f32 to vector<8x128xf32>
      %19 = arith.maximumf %3, %18 : vector<8x128xf32>
      %20 = arith.mulf %3, %4 : vector<8x128xf32>
      %21 = arith.subf %19, %20 : vector<8x128xf32>
      %22 = math.log1p %17 : vector<8x128xf32>
      %23 = arith.addf %21, %22 : vector<8x128xf32>
      %c0_9 = arith.constant 0 : index
      %c0_10 = arith.constant 0 : index
      %24 = vector.load %arg4[%c0_9, %c0_10] : memref<8x128xf32, #tpu.memory_space<vmem>>, vector<8x128xf32>
      %cst_11 = arith.constant dense<0.000000e+00> : vector<8xf32>
      %25 = vector.multi_reduction <add>, %23, %cst_11 [1] : vector<8x128xf32> to vector<8xf32>
      %26 = vector.shape_cast %25 : vector<8xf32> to vector<8x1xf32>
      %27 = vector.broadcast %26 : vector<8x1xf32> to vector<8x128xf32>
      %28 = arith.addf %24, %27 : vector<8x128xf32>
      %c0_12 = arith.constant 0 : index
      %c0_13 = arith.constant 0 : index
      %29 = vector.load %arg4[%c0_12, %c0_13] : memref<8x128xf32, #tpu.memory_space<vmem>>, vector<8x128xf32>
      tpu.vector_store %arg4[%c0_12, %c0_13], %28 {strides = array<i32>} : memref<8x128xf32, #tpu.memory_space<vmem>>, vector<8x128xf32>,
    } else {
    }
    %c2_i32 = arith.constant 2 : i32
    %11 = arith.cmpi eq, %arg0, %c2_i32 : i32
    %12 = arith.extui %11 : i1 to i32
    %c0_i32_7 = arith.constant 0 : i32
    %13 = arith.cmpi ne, %12, %c0_i32_7 : i32
    scf.if %13 {
      %14 = arith.subf %3, %4 : vector<8x128xf32>
      %15 = math.absf %14 : vector<8x128xf32>
      %cst = arith.constant 1.000000e+00 : f32
      %16 = vector.broadcast %cst : f32 to vector<8x128xf32>
      %17 = arith.cmpf olt, %15, %16 : vector<8x128xf32>
      %cst_8 = arith.constant 5.000000e-01 : f32
      %18 = vector.broadcast %cst_8 : f32 to vector<8x128xf32>
      %19 = arith.mulf %18, %15 : vector<8x128xf32>
      %20 = arith.mulf %19, %15 : vector<8x128xf32>
      %cst_9 = arith.constant 5.000000e-01 : f32
      %21 = vector.broadcast %cst_9 : f32 to vector<8x128xf32>
      %22 = arith.subf %15, %21 : vector<8x128xf32>
      %23 = arith.select %17, %20, %22 : vector<8x128xi1>, vector<8x128xf32>
      %c0_10 = arith.constant 0 : index
      %c0_11 = arith.constant 0 : index
      %24 = vector.load %arg4[%c0_10, %c0_11] : memref<8x128xf32, #tpu.memory_space<vmem>>, vector<8x128xf32>
      %cst_12 = arith.constant dense<0.000000e+00> : vector<8xf32>
      %25 = vector.multi_reduction <add>, %23, %cst_12 [1] : vector<8x128xf32> to vector<8xf32>
      %26 = vector.shape_cast %25 : vector<8xf32> to vector<8x1xf32>
      %27 = vector.broadcast %26 : vector<8x1xf32> to vector<8x128xf32>
      %28 = arith.addf %24, %27 : vector<8x128xf32>
      %c0_13 = arith.constant 0 : index
      %c0_14 = arith.constant 0 : index
      %29 = vector.load %arg4[%c0_13, %c0_14] : memref<8x128xf32, #tpu.memory_space<vmem>>, vector<8x128xf32>
      tpu.vector_store %arg4[%c0_13, %c0_14], %28 {strides = array<i32>} : memref<8x128xf32, #tpu.memory_space<vmem>>, vector<8x128xf32>,
    } else {
    }
    return
  }
  func.func @transform_0(%arg0: i32, %arg1: i32) -> (i32, i32) {
    %c0_i32 = arith.constant 0 : i32
    return %arg0, %arg1 : i32, i32
  }
  func.func @transform_1(%arg0: i32, %arg1: i32) -> (i32, i32) {
    %c0_i32 = arith.constant 0 : i32
    return %arg0, %arg1 : i32, i32
  }
  func.func @transform_2(%arg0: i32, %arg1: i32) -> (i32, i32) {
    %c0_i32 = arith.constant 0 : i32
    %c0_i32_0 = arith.constant 0 : i32
    return %arg0, %c0_i32 : i32, i32
  }
}

</mosaic_0001>

<bundles_post_ra>
// kernel: tpu_custom_call.1
= control target key start
LH: loop header
LB: loop body
LE: loop exit
PB: predicated region body
PF: predicated region fallthrough
CT: control target
= control target key end

     0   :  { %7 = vsyncpa [#allocation3], 0  ;;  %s873_s0 = inlined_call_operand.hbm [shape: f32[24,128], index: 0, kind: input, shape index: {}]   ;;  %s874_s1 = inlined_call_operand.hbm [shape: f32[24,128], index: 1, kind: input, shape index: {}]   ;;  %s875_s2 = inlined_call_operand.hbm [shape: f32[24,128], index: 2, kind: output, shape index: {}]  }
   0x1   :  { %9 = vsyncpa [#allocation3 + $0x1], 0 }
   0x2   :  { %10 = vsyncpa [#allocation6], 0 }
   0x3   :  { %12 = vsyncpa [#allocation6 + $0x1], 0 }
   0x4   :  { %13 = vsyncpa [#allocation4], 0 }
   0x5   :  { %15 = vsyncpa [#allocation4 + $0x1], 0  ;;  %s683_s9 = smov 0   ;;  %s685_s10 = smov 0  }
   0x6   :  { %s687_s11 = smov 0   ;;  %s689_s12 = smov 0  }
   0x7   :  { %s691_s13 = smov 0   ;;  %s693_s14 = smov 0  }
   0x8 LB: > { %s424_s15 = sadd.s32 4294967295, %s662_s14   ;;  %s425_s16 = sadd.s32 4294967294, %s662_s14   ;;  %s662_s14 = sphi %s693_s14, %s21_s14   ;;  %s658_s13 = sphi %s691_s13, %s886_s13   ;;  %s654_s12 = sphi %s689_s12, %s885_s12   ;;  %s650_s11 = sphi %s687_s11, %s884_s11   ;;  %s646_s10 = sphi %s685_s10, %s883_s10   ;;  %s642_s9 = sphi %s683_s9, %s882_s9  }
   0x9   : > { %s33_s17 = sadd.s32 1, %s658_s13  ;;  %s42_s18 = sadd.s32 1, %s650_s11 }
   0xa   : > { %p35_p0 = scmp.ge.s32.totalorder %s33_s17, 3  ;;  %p49_p1 = scmp.ne.s32.totalorder %s650_s11, %s646_s10 }
   0xb   : > { %p50_p2 = scmp.eq.s32.totalorder %s662_s14, 0  ;;  %p55_p3 = scmp.ne.s32.totalorder %s646_s10, %s642_s9 }
   0xc   : > { %s888_s17 = smov (%p35_p0, %s33_s17), 0  ;;  %p56_p5 = scmp.eq.s32.totalorder %s424_s15, 0 }
   0xd   : > { %p724_p4 = por %p50_p2, %p49_p1  ;;  %s37_s20 = ssub.s32 %s658_s13, %s888_s17 }
   0xe   : > { %p107_p6 = scmp.eq.s32.totalorder %s424_s15, 2  ;;  %p40_p7 = scmp.eq.s32.totalorder %s37_s20, 0 }
   0xf   : > { %p730_p8 = por %p56_p5, %p55_p3  ;;  %p113_p10 = scmp.eq.s32.totalorder %s425_s16, 2 }
  0x10   : > { %p734_p9 = por %p107_p6, %p49_p1  ;;  %p461_p12 = scmp.lt.s32.totalorder %s662_s14, 3 }
  0x11   : > { %s739_s23 = scalar_select %p40_p7, %s650_s11, %s42_s18  }
  0x12   : > { %p741_p11 = por %p113_p10, %p55_p3  ;;  %s747_s25 = sand.u32 1, %s650_s11  }
  0x13   : > { %s428_s26 = sshll.u32 %s747_s25, 3  ;;  %s429_s27 = sshll.u32 %s658_s13, 7 }
  0x14   : > { %s143_s30 = scalar_lea.hbm %s873_s0, %s429_s27  ;;  %s137_s3 = scalar_lea.vmem [#allocation2], %s428_s26 }
  0x15   : > { %s145_s4 = sshll.u32 %s137_s3, 4  ;;  %p756_p13 = pnand %p461_p12, %p724_p4  ;;  %s146_s4 = int_to_ptr.vmem [resolvable:$true] %s145_s4 }
  0x16   : > { %p432_p0 = scmp.ge.s32.totalorder %s662_s14, 1  ;;  %p169_p1 = scmp.lt.s32.totalorder %s662_s14, 4 }
  0x17   : > { %s134_s6 = scalar_lea.sflag [#allocation3], %s747_s25  ;;  %p524_p2 = pneg %p756_p13 }
  0x18   : > { %s535_s7 = scalar_lea.vmem %s146_s4, 128  ;;  %s664_s8 = smov [#allocation2]  }
  0x19   : > { %p536_p3 = scmp.ne.s32.totalorder %s146_s4, %s535_s7  ;;  %s540_s15 = sshll.u32 %s664_s8, 4  ;;  %s541_s15 = int_to_ptr.vmem [resolvable:$false] %s540_s15 }
  0x1a   : > { %s542_s16 = scalar_lea.vmem %s541_s15, 256  ;;  %p543_p4 = scmp.lt.s32.totalorder %s146_s4, %s541_s15 }
  0x1b   : > { %p538_p5 = pnand %p536_p3, %p524_p2  ;;  %p544_p7 = scmp.lt.s32.totalorder %s542_s16, %s535_s7 }
  0x1d   : > { %p539_p6 = pneg %p538_p5  ;;  %p545_p10 = por %p544_p7, %p543_p4 }
  0x1f   : > { %p546_p12 = pnand %p545_p10, %p539_p6 }
  0x21   : > { %549 = shalt.err (!%p546_p12)
}
  0x22   : > { %453 = dma.hbm_to_vmem [thread:$0]  (!%p756_p13), %s143_s30, 128, %s146_s4, %s134_s6  }
  0x23   : > { %p774_p3 = pnand %p432_p0, %p169_p1  ;;  %s162_s28 = scalar_lea.hbm %s874_s1, %s429_s27 }
  0x24   : > { %s156_s29 = scalar_lea.vmem [#allocation5], %s428_s26  ;;  %s153_s7 = scalar_lea.sflag [#allocation6], %s747_s25 }
  0x25   : > { %s164_s3 = sshll.u32 %s156_s29, 4  ;;  %s665_s30 = smov [#allocation5]   ;;  %s165_s3 = int_to_ptr.vmem [resolvable:$true] %s164_s3 }
  0x26   : > { %s563_s8 = scalar_lea.vmem %s165_s3, 128  ;;  %s568_s4 = sshll.u32 %s665_s30, 4  ;;  %s569_s4 = int_to_ptr.vmem [resolvable:$false] %s568_s4 }
  0x27   : > { %p564_p5 = scmp.ne.s32.totalorder %s165_s3, %s563_s8  ;;  %s570_s6 = scalar_lea.vmem %s569_s4, 256 }
  0x28   : > { %p571_p0 = scmp.lt.s32.totalorder %s165_s3, %s569_s4  ;;  %p572_p1 = scmp.lt.s32.totalorder %s570_s6, %s563_s8 }
  0x29   : > { %p566_p6 = pnand %p564_p5, %p524_p2 }
  0x2a   : > { %p573_p7 = por %p572_p1, %p571_p0 }
  0x2b   : > { %p567_p4 = pneg %p566_p6 }
  0x2d   : > { %p574_p10 = pnand %p573_p7, %p567_p4 }
  0x2f   : > { %577 = shalt.err (!%p574_p10)
}
  0x30   : > { %456 = dma.hbm_to_vmem [thread:$0]  (!%p756_p13), %s162_s28, 128, %s165_s3, %s153_s7  }
  0x31   : > { %173 = sbr.rel (%p774_p3) target bundleno = 628 (0x274), region = 28  ;;  %s790_s25 = sand.u32 (!%p774_p3), 1, %s646_s10  }
  0x32   : > { %s433_s26 = sshll.u32 (!%p774_p3), %s790_s25, 3  ;;  %s176_s27 = scalar_lea.sflag (!%p774_p3), [#allocation3], %s790_s25 }
  0x33   : > { %s179_s15 = scalar_lea.vmem (!%p774_p3), [#allocation2], %s433_s26 }
  0x36   : > { %629 = dma.done.wait (%p730_p8), %s176_s27, 128  }
  0x37   : > { %631 = vsyncadd (%p730_p8), %s176_s27, 4294967168  ;;  %s185_s5 = scalar_lea.sflag [#allocation6], %s790_s25  ;;  %s188_s16 = scalar_lea.vmem [#allocation5], %s433_s26 }
  0x38   : > { %633 = dma.done.wait (%p730_p8), %s185_s5, 128  }
  0x39   : > { %635 = vsyncadd (%p730_p8), %s185_s5, 4294967168  ;;  %s803_s18 = scalar_lea.vmem [#allocation7], %s433_s26  ;;  %v666_v0 = vmov 0.0   ;;  %v806_v1 = vld [vmem:[%s179_s15] sm:$0xff]  ;;  %v808_v2 = vld [vmem:[%s188_s16] sm:$0xff]  ;;  %p436_p13 = scmp.ne.s32.totalorder %s654_s12, 0 }
  0x3a   : > { %218 = vst [vmem:[%s803_s18] sm:$0xff] %v666_v0 }
  0x3b   : > { %224 = sbr.rel (%p436_p13) target bundleno = 259 (0x103), region = 44 }
  0x40   : > { %v225_v3 = vand.u32 2147483647, %v806_v1  ;;  %v229_v13 = vmax.f32 %v806_v1, 0.0  ;;  %v230_v14 = vmul.f32 %v808_v2, %v806_v1  ;;  %vm245_vm0 = vcmp.ge.f32.partialorder %v806_v1, 0.0 }
  0x41   : > { %v250_v18 = vsub.f32 1.0, %v808_v2  ;;  %v256_v27 = vmul.f32 0.25, %v808_v2  ;;  %v260_v34 = vld [vmem:[%s803_s18] sm:$0xff] }
  0x42   : > { %v226_v4 = vsub.f32 0.0, %v225_v3  ;;  %v231_v20 = vsub.f32 %v229_v13, %v230_v14 }
  0x43   : > { %v257_v28 = vmul.f32 0.75, %v250_v18 }
  0x44   : > { %v227_v5 = vmul.f32 1.442695, %v226_v4 }
  0x45   : > { %v258_v31 = vadd.f32 %v257_v28, %v256_v27 }
  0x46   : > { %512 = vpow2.f32 %v227_v5 }
  0x53   : > { %v513_v6 = vpop.eup %512 }
  0x54   : > { %v232_v7 = vadd.f32 1.0, %v513_v6  ;;  %v235_v8 = vmul.f32 -0.5, %v513_v6  ;;  %v238_v10 = vand.u32 2147483647, %v513_v6 }
  0x56   : > { %514 = vlog2.f32 %v232_v7  ;;  %v236_v9 = vadd.f32 1.0, %v235_v8  ;;  %vm239_vm1 = vcmp.lt.f32.partialorder %v238_v10, 0.0004427343 }
  0x57   : > { %516 = vrcp.f32 %v232_v7 }
  0x58   : > { %v237_v16 = vmul.f32 %v513_v6, %v236_v9 }
  0x63   : > { %v515_v11 = vpop.eup %514 }
  0x64   : > { %v517_v12 = vpop.eup %516  ;;  %v234_v15 = vmul.f32 0.6931472, %v515_v11 }
  0x65   : > { %v246_v17 = vmul.f32 %v517_v12, %v513_v6 }
  0x66   : > { %v240_v23 = vsel %vm239_vm1, %v237_v16, %v234_v15 }
  0x67   : > { %v247_v19 = vsel %vm245_vm0, %v517_v12, %v246_v17  ;;  %v241_v25 = vadd.f32 %v240_v23, %v231_v20 }
  0x68   : > { %v248_v21 = vmul.f32 %v247_v19, %v808_v2  ;;  %v249_v22 = vsub.f32 1.0, %v247_v19 }
  0x6a   : > { %v251_v24 = vmul.f32 %v250_v18, %v249_v22 }
  0x6c   : > { %v252_v26 = vadd.f32 %v251_v24, %v248_v21 }
  0x6e   : > { %v253_v29 = vsub.f32 1.0, %v252_v26 }
  0x70   : > { %v254_v30 = vmul.f32 %v253_v29, %v241_v25 }
  0x72   : > { %v255_v32 = vmul.f32 %v254_v30, %v253_v29 }
  0x74   : > { %v259_v33 = vmul.f32 %v258_v31, %v255_v32 }
  0x76   : > { %261 = vadd.xlane.f32.xlu0 %v259_v33 }
  0xff   : > { %v262_v35 = vpop.xlane.xlu0 %261 }
 0x100   : > { %v263_v36 = vadd.f32 %v262_v35, %v260_v34 }
 0x102   : > { %264 = vst [vmem:[%s803_s18] sm:$0xff] %v263_v36 }
 0x103 PF: > { %p437_p8 = scmp.ne.s32.totalorder %s654_s12, 1 }
 0x105   : > { %268 = sbr.rel (%p437_p8) target bundleno = 448 (0x1c0), region = 48 }
 0x10a   : > { %v269_v37 = vand.u32 2147483647, %v806_v1  ;;  %v273_v44 = vmax.f32 %v806_v1, 0.0  ;;  %v274_v45 = vmul.f32 %v808_v2, %v806_v1  ;;  %v286_v53 = vld [vmem:[%s803_s18] sm:$0xff] }
 0x10c   : > { %v270_v38 = vsub.f32 0.0, %v269_v37  ;;  %v275_v49 = vsub.f32 %v273_v44, %v274_v45 }
 0x10e   : > { %v271_v39 = vmul.f32 1.442695, %v270_v38 }
 0x110   : > { %518 = vpow2.f32 %v271_v39 }
 0x11d   : > { %v519_v40 = vpop.eup %518 }
 0x11e   : > { %v276_v41 = vadd.f32 1.0, %v519_v40  ;;  %v279_v42 = vmul.f32 -0.5, %v519_v40  ;;  %v282_v46 = vand.u32 2147483647, %v519_v40 }
 0x120   : > { %520 = vlog2.f32 %v276_v41  ;;  %v280_v43 = vadd.f32 1.0, %v279_v42  ;;  %vm283_vm2 = vcmp.lt.f32.partialorder %v282_v46, 0.0004427343 }
 0x122   : > { %v281_v47 = vmul.f32 %v519_v40, %v280_v43 }
 0x12d   : > { %v521_v48 = vpop.eup %520 }
 0x12e   : > { %v278_v50 = vmul.f32 0.6931472, %v521_v48 }
 0x130   : > { %v284_v51 = vsel %vm283_vm2, %v281_v47, %v278_v50 }
 0x131   : > { %v285_v52 = vadd.f32 %v284_v51, %v275_v49 }
 0x133   : > { %287 = vadd.xlane.f32.xlu0 %v285_v52 }
 0x1bc   : > { %v288_v54 = vpop.xlane.xlu0 %287 }
 0x1bd   : > { %v289_v55 = vadd.f32 %v288_v54, %v286_v53 }
 0x1bf   : > { %290 = vst [vmem:[%s803_s18] sm:$0xff] %v289_v55 }
 0x1c0 PF: > { %p438_p2 = scmp.ne.s32.totalorder %s654_s12, 2 }
 0x1c2   : > { %294 = sbr.rel (%p438_p2) target bundleno = 605 (0x25d), region = 52 }
 0x1c7   : > { %v295_v56 = vsub.f32 %v806_v1, %v808_v2  ;;  %v302_v62 = vld [vmem:[%s803_s18] sm:$0xff] }
 0x1c9   : > { %v296_v57 = vand.u32 2147483647, %v295_v56 }
 0x1cb   : > { %v298_v58 = vmul.f32 0.5, %v296_v57  ;;  %v439_v59 = vadd.f32 -0.5, %v296_v57  ;;  %vm297_vm3 = vcmp.lt.f32.partialorder %v296_v57, 1.0 }
 0x1cd   : > { %v299_v60 = vmul.f32 %v298_v58, %v296_v57 }
 0x1cf   : > { %v301_v61 = vsel %vm297_vm3, %v299_v60, %v439_v59 }
 0x1d0   : > { %303 = vadd.xlane.f32.xlu0 %v301_v61 }
 0x259   : > { %v304_v63 = vpop.xlane.xlu0 %303 }
 0x25a   : > { %v305_v0 = vadd.f32 %v304_v63, %v302_v62 }
 0x25c   : > { %306 = vst [vmem:[%s803_s18] sm:$0xff] %v305_v0 }
 0x25d PF: > { %s441_s21 = sshll.u32 %s654_s12, 7  ;;  %s321_s29 = sshll.u32 %s803_s18, 4  ;;  %s322_s29 = int_to_ptr.vmem [resolvable:$true] %s321_s29 }
 0x25e   : > { %s319_s28 = scalar_lea.hbm %s875_s2, %s441_s21  ;;  %s308_s3 = scalar_lea.sflag [#allocation4], %s790_s25 }
 0x25f   : > { %s578_s7 = scalar_lea.vmem %s322_s29, 128  ;;  %s667_s8 = smov [#allocation7]  }
 0x260   : > { %p579_p12 = scmp.ne.s32.totalorder %s322_s29, %s578_s7  ;;  %s582_s30 = sshll.u32 %s667_s8, 4  ;;  %s583_s30 = int_to_ptr.vmem [resolvable:$false] %s582_s30 }
 0x261   : > { %s584_s4 = scalar_lea.vmem %s583_s30, 256  ;;  %p585_p6 = scmp.lt.s32.totalorder %s322_s29, %s583_s30 }
 0x262   : > { %p580_p3 = pnand %p579_p12, %p734_p9  ;;  %p586_p4 = scmp.lt.s32.totalorder %s584_s4, %s578_s7 }
 0x264   : > { %p581_p5 = pneg %p580_p3  ;;  %p587_p0 = por %p586_p4, %p585_p6 }
 0x266   : > { %p588_p1 = pnand %p587_p0, %p581_p5 }
 0x268   : > { %591 = shalt.err (!%p588_p1)
}
 0x269   : > { %s592_s12 = scalar_lea.hbm %s319_s28, 128  ;;  %s596_s26 = scalar_lea.hbm %s875_s2, 384 }
 0x26a   : > { %p593_p7 = scmp.ne.s32.totalorder %s319_s28, %s592_s12  ;;  %p597_p8 = scmp.lt.s32.totalorder %s319_s28, %s875_s2 }
 0x26b   : > { %p598_p2 = scmp.lt.s32.totalorder %s596_s26, %s592_s12 }
 0x26c   : > { %p594_p10 = pnand %p593_p7, %p734_p9 }
 0x26d   : > { %p599_p12 = por %p598_p2, %p597_p8 }
 0x26e   : > { %p595_p13 = pneg %p594_p10 }
 0x270   : > { %p600_p3 = pnand %p599_p12, %p595_p13 }
 0x272   : > { %603 = shalt.err (!%p600_p3)
}
 0x273   : > { %448 = dma.vmem_to_hbm [thread:$0]  (%p734_p9), %s322_s29, 128, %s319_s28, %s308_s3  }
 0x274 PF: > { %p462_p5 = scmp.ge.s32.totalorder %s662_s14, 2  ;;  %s333_s5 = sand.u32 1, %s642_s9  }
 0x275   : > { %s334_s16 = scalar_lea.sflag [#allocation4], %s333_s5 }
 0x276   : > { %p458_p6 = pnand %p462_p5, %p741_p11 }
 0x278   : > { %p459_p4 = pneg %p458_p6 }
 0x27a   : > { %637 = dma.done.wait (%p459_p4), %s334_s16, 128  }
 0x27b   : > { %639 = vsyncadd (%p459_p4), %s334_s16, 4294967168  ;;  %s21_s14 = sadd.s32 1, %s662_s14   ;;  %s882_s9 = smov %s646_s10 }
 0x27c   : > { %p18_p0 = scmp.ge.s32.totalorder %s21_s14, 5   ;;  %s883_s10 = smov %s650_s11 }
 0x27d   : > { %s884_s11 = smov %s739_s23  ;;  %s885_s12 = smov %s658_s13 }
 0x27e   : > { %s886_s13 = smov %s888_s17  ;;  %20 = sbr.rel (!%p18_p0) target bundleno = 8 (0x8), region = 102 }
 0x283   :  { %339 = vsyncpa [#allocation3], 1 }
 0x284   :  { %341 = vsyncpa [#allocation3 + $0x1], 1 }
 0x285   :  { %342 = vsyncpa [#allocation6], 1 }
 0x286   :  { %344 = vsyncpa [#allocation6 + $0x1], 1 }
 0x287   :  { %345 = vsyncpa [#allocation4], 1 }
 0x288   :  { %347 = vsyncpa [#allocation4 + $0x1], 1 }

</bundles_post_ra>
